<compile_context>
chip_gen: v7x
topology: tpu7x:2x2x1
jax: 0.10.0
libtpu: 0.0.40
codegen_flags: <defaults>
</compile_context>

<pallas_src>
import jax
import jax.numpy as jnp
from jax.experimental import pallas as pl
from jax.experimental.pallas import tpu as pltpu


def _round_up(n, m):
    return (n + m - 1) // m * m


def simple_nn_kernel(x_ref, w1_ref, b1_ref, w2_ref, b2_ref, o_ref):
    w1 = w1_ref[...]
    w2 = w2_ref[...]
    # fc1: [tb, F] @ [F, H] on the MXU, f32 accumulation.  The activation tile
    # is cast to the weight dtype in VMEM (no extra HBM pass over x).
    h = jnp.dot(x_ref[...].astype(w1.dtype), w1,
                preferred_element_type=jnp.float32)
    h = h + b1_ref[...]                                   # f32 bias add (VPU)
    # sigmoid: exp on the EUP; approx reciprocal also uses the EUP slot,
    # keeping VALU slots free (no Newton-iteration f32 divide).
    h = pl.reciprocal(1.0 + jnp.exp(-h), approx=True)
    # fc2: [tb, H] @ [H, C], f32 accumulation; lane-narrow (C=3) store.
    out = jnp.dot(h.astype(w2.dtype), w2, preferred_element_type=jnp.float32)
    o_ref[...] = (out + b2_ref[...]).astype(o_ref.dtype)


def prepare_params(w1, b1, w2, b2, *, compute_dtype=jnp.float32):
    """One-time parameter prep, hoisted out of the per-call forward:
    cast weights to the MXU compute dtype; biases stay f32 (they are added
    to the f32 MXU accumulator inside the kernel)."""
    return (w1.astype(compute_dtype),
            b1.astype(jnp.float32).reshape(1, -1),
            w2.astype(compute_dtype),
            b2.astype(jnp.float32).reshape(1, -1))


def _pick_batch_tile(B):
    # Small batch: single full-dim block (legal without 8-alignment).
    if B <= 256:
        return B
    # Otherwise: >=2 grid steps so both v7x TensorCores get work, capped at
    # 4096 rows/tile to amortize per-step overhead with long DMA bursts while
    # staying far inside every generation's scoped-VMEM default.
    half = -(-B // 2)
    return min(_round_up(half, 8), 4096)


def simple_nn_forward(x, w1, b1, w2, b2, *, block_b=None):
    """logits = sigmoid(x @ w1 + b1) @ w2 + b2

    x: [B, F]; w1: [F, H]; b1: [1, H]; w2: [H, C]; b2: [1, C].
    Weights/biases should already be in their compute dtype (prepare_params).
    """
    B, F = x.shape
    H = w1.shape[1]
    C = w2.shape[1]

    tb = block_b if block_b is not None else _pick_batch_tile(B)
    grid = (pl.cdiv(B, tb),)

    return pl.pallas_call(
        simple_nn_kernel,
        out_shape=jax.ShapeDtypeStruct((B, C), jnp.float32),
        grid_spec=pl.GridSpec(
            grid=grid,
            in_specs=[
                pl.BlockSpec((tb, F), lambda i: (i, 0)),  # x tile streams (F = full dim)
                pl.BlockSpec((F, H), lambda i: (0, 0)),   # w1 resident (full dims)
                pl.BlockSpec((1, H), lambda i: (0, 0)),   # b1 resident
                pl.BlockSpec((H, C), lambda i: (0, 0)),   # w2 resident (full dims)
                pl.BlockSpec((1, C), lambda i: (0, 0)),   # b2 resident
            ],
            # Unpadded, lane-narrow output; partial last block uses masked writes.
            out_specs=pl.BlockSpec((tb, C), lambda i: (i, 0)),
        ),
        compiler_params=pltpu.CompilerParams(
            # Batch tiles are independent -> shard across TensorCores on v7x.
            dimension_semantics=("parallel",),
        ),
    )(x, w1, b1, w2, b2)


def init_params(key, input_size, hidden_size, output_size):
    """Deterministic init mimicking nn.Linear's U(-1/sqrt(fan_in), 1/sqrt(fan_in))."""
    k1, k2, k3, k4 = jax.random.split(key, 4)
    bound1 = 1.0 / jnp.sqrt(input_size)
    bound2 = 1.0 / jnp.sqrt(hidden_size)
    w1 = jax.random.uniform(k1, (input_size, hidden_size), jnp.float32, -bound1, bound1)
    b1 = jax.random.uniform(k2, (1, hidden_size), jnp.float32, -bound1, bound1)
    w2 = jax.random.uniform(k3, (hidden_size, output_size), jnp.float32, -bound2, bound2)
    b2 = jax.random.uniform(k4, (1, output_size), jnp.float32, -bound2, bound2)
    return w1, b1, w2, b2


if __name__ == "__main__":
    # Iris-like sizes: 4 features, 64 hidden, 3 classes; small batch.
    batch = 8
    input_size = 4
    hidden_size = 64
    output_size = 3

    key = jax.random.PRNGKey(0)
    kx, kp = jax.random.split(key)
    x = jax.random.normal(kx, (batch, input_size), jnp.float32)  # "standardized" inputs
    w1, b1, w2, b2 = init_params(kp, input_size, hidden_size, output_size)

    def ref_fn(xv):
        return (1.0 / (1.0 + jnp.exp(-(xv @ w1 + b1)))) @ w2 + b2

    # f32 path, single grid step (full-dim batch block).
    p32 = prepare_params(w1, b1, w2, b2, compute_dtype=jnp.float32)
    out = jax.block_until_ready(simple_nn_forward(x, *p32))
    assert out.shape == (batch, output_size)
    assert jnp.allclose(out, ref_fn(x), atol=5e-3, rtol=5e-3), "f32 path mismatch"

    # Non-dividing medium batch: 2-step grid (both v7x cores) + masked partial
    # last block, bf16 weights with f32 MXU accumulation.
    xb = jax.random.normal(jax.random.PRNGKey(1), (300, input_size), jnp.float32)
    pbf = prepare_params(w1, b1, w2, b2, compute_dtype=jnp.bfloat16)
    out_b = jax.block_until_ready(simple_nn_forward(xb, *pbf))
    assert out_b.shape == (300, output_size)
    assert jnp.allclose(out_b, ref_fn(xb), atol=5e-2, rtol=5e-2), "bf16 path mismatch"

    print("KERNEL_OK")
</pallas_src>

<mosaic_0001>
module attributes {stable_mosaic.version = 11 : i64} {
  func.func @simple_nn_kernel(%arg0: i32, %arg1: memref<8x4xf32, #tpu.memory_space<vmem>>, %arg2: memref<4x64xf32, #tpu.memory_space<vmem>>, %arg3: memref<1x64xf32, #tpu.memory_space<vmem>>, %arg4: memref<64x3xf32, #tpu.memory_space<vmem>>, %arg5: memref<1x3xf32, #tpu.memory_space<vmem>>, %arg6: memref<8x3xf32, #tpu.memory_space<vmem>>) attributes {dimension_semantics = [#tpu.dimension_semantics<parallel>], iteration_bounds = array<i64: 1>, scalar_prefetch = 0 : i64, scratch_operands = 0 : i64, tpu.core_type = #tpu.core_type<tc>, window_params = [{transform_indices = @transform_0, window_bounds = array<i64: 8, 4>}, {pipeline_mode = #tpu.pipeline_mode<synchronous>, transform_indices = @transform_1, window_bounds = array<i64: 4, 64>}, {pipeline_mode = #tpu.pipeline_mode<synchronous>, transform_indices = @transform_2, window_bounds = array<i64: 1, 64>}, {pipeline_mode = #tpu.pipeline_mode<synchronous>, transform_indices = @transform_3, window_bounds = array<i64: 64, 3>}, {pipeline_mode = #tpu.pipeline_mode<synchronous>, transform_indices = @transform_4, window_bounds = array<i64: 1, 3>}, {transform_indices = @transform_5, window_bounds = array<i64: 8, 3>}]} {
    %c0 = arith.constant 0 : index
    %c0_0 = arith.constant 0 : index
    %0 = vector.load %arg2[%c0, %c0_0] : memref<4x64xf32, #tpu.memory_space<vmem>>, vector<4x64xf32>
    %c0_1 = arith.constant 0 : index
    %c0_2 = arith.constant 0 : index
    %1 = vector.load %arg4[%c0_1, %c0_2] : memref<64x3xf32, #tpu.memory_space<vmem>>, vector<64x3xf32>
    %c0_3 = arith.constant 0 : index
    %c0_4 = arith.constant 0 : index
    %2 = vector.load %arg1[%c0_3, %c0_4] : memref<8x4xf32, #tpu.memory_space<vmem>>, vector<8x4xf32>
    %cst = arith.constant dense<0.000000e+00> : vector<8x64xf32>
    %3 = tpu.matmul %2, %0, %cst {dimension_numbers = #tpu.dot_dimension_numbers<[1], [0], [0], [1], [0, 0, 1, 1], [], []>} : vector<8x4xf32>, vector<4x64xf32>, vector<8x64xf32> -> vector<8x64xf32>
    %c0_5 = arith.constant 0 : index
    %c0_6 = arith.constant 0 : index
    %4 = vector.load %arg3[%c0_5, %c0_6] : memref<1x64xf32, #tpu.memory_space<vmem>>, vector<1x64xf32>
    %5 = vector.broadcast %4 : vector<1x64xf32> to vector<8x64xf32>
    %6 = arith.addf %3, %5 : vector<8x64xf32>
    %cst_7 = arith.constant 0.000000e+00 : f32
    %7 = vector.broadcast %cst_7 : f32 to vector<8x64xf32>
    %8 = arith.subf %7, %6 : vector<8x64xf32>
    %9 = math.exp %8 : vector<8x64xf32>
    %cst_8 = arith.constant 1.000000e+00 : f32
    %10 = vector.broadcast %cst_8 : f32 to vector<8x64xf32>
    %11 = arith.addf %10, %9 : vector<8x64xf32>
    %12 = tpu.reciprocal %11 {approx = true} : vector<8x64xf32> -> vector<8x64xf32>
    %cst_9 = arith.constant dense<0.000000e+00> : vector<8x3xf32>
    %13 = tpu.matmul %12, %1, %cst_9 {dimension_numbers = #tpu.dot_dimension_numbers<[1], [0], [0], [1], [0, 0, 1, 1], [], []>} : vector<8x64xf32>, vector<64x3xf32>, vector<8x3xf32> -> vector<8x3xf32>
    %c0_10 = arith.constant 0 : index
    %c0_11 = arith.constant 0 : index
    %14 = vector.load %arg5[%c0_10, %c0_11] : memref<1x3xf32, #tpu.memory_space<vmem>>, vector<1x3xf32>
    %15 = vector.broadcast %14 : vector<1x3xf32> to vector<8x3xf32>
    %16 = arith.addf %13, %15 : vector<8x3xf32>
    %c0_12 = arith.constant 0 : index
    %c0_13 = arith.constant 0 : index
    %17 = vector.load %arg6[%c0_12, %c0_13] : memref<8x3xf32, #tpu.memory_space<vmem>>, vector<8x3xf32>
    tpu.vector_store %arg6[%c0_12, %c0_13], %16 {strides = array<i32>} : memref<8x3xf32, #tpu.memory_space<vmem>>, vector<8x3xf32>,
    return
  }
  func.func @transform_0(%arg0: i32) -> (i32, i32) {
    %c0_i32 = arith.constant 0 : i32
    %c0_i32_0 = arith.constant 0 : i32
    return %arg0, %c0_i32 : i32, i32
  }
  func.func @transform_1(%arg0: i32) -> (i32, i32) {
    %c0_i32 = arith.constant 0 : i32
    %c0_i32_0 = arith.constant 0 : i32
    %c0_i32_1 = arith.constant 0 : i32
    return %c0_i32, %c0_i32_0 : i32, i32
  }
  func.func @transform_2(%arg0: i32) -> (i32, i32) {
    %c0_i32 = arith.constant 0 : i32
    %c0_i32_0 = arith.constant 0 : i32
    %c0_i32_1 = arith.constant 0 : i32
    return %c0_i32, %c0_i32_0 : i32, i32
  }
  func.func @transform_3(%arg0: i32) -> (i32, i32) {
    %c0_i32 = arith.constant 0 : i32
    %c0_i32_0 = arith.constant 0 : i32
    %c0_i32_1 = arith.constant 0 : i32
    return %c0_i32, %c0_i32_0 : i32, i32
  }
  func.func @transform_4(%arg0: i32) -> (i32, i32) {
    %c0_i32 = arith.constant 0 : i32
    %c0_i32_0 = arith.constant 0 : i32
    %c0_i32_1 = arith.constant 0 : i32
    return %c0_i32, %c0_i32_0 : i32, i32
  }
  func.func @transform_5(%arg0: i32) -> (i32, i32) {
    %c0_i32 = arith.constant 0 : i32
    %c0_i32_0 = arith.constant 0 : i32
    return %arg0, %c0_i32 : i32, i32
  }
}

</mosaic_0001>

<bundles_post_ra>
// kernel: tpu_custom_call.1
= control target key start
LH: loop header
LB: loop body
LE: loop exit
PB: predicated region body
PF: predicated region fallthrough
CT: control target
= control target key end

     0   :  { %vm41_vm0 = vcmask 1043456   ;;  %vm37_vm1 = vcmask 31744   ;;  %v266_v0 = vmov 0.0   ;;  %vm267_vm2 = vmmov 0   ;;  %s338_s1 = inlined_call_operand.vmem [shape: f32[4,64], index: 1, kind: input, shape index: {}]   ;;  %s339_s0 = inlined_call_operand.vmem [shape: f32[8,4], index: 0, kind: input, shape index: {}]   ;;  %s340_s3 = inlined_call_operand.vmem [shape: f32[64,3], index: 3, kind: input, shape index: {}]   ;;  %s341_s2 = inlined_call_operand.vmem [shape: f32[1,64], index: 2, kind: input, shape index: {}]   ;;  %s342_s4 = inlined_call_operand.vmem [shape: f32[1,3], index: 4, kind: input, shape index: {}]   ;;  %s343_s5 = inlined_call_operand.vmem [shape: f32[8,3], index: 5, kind: output, shape index: {}]  }
   0x1   :  { %223 = vmatprep.subr.mxu0 %v266_v0  ;;  %v20_v1 = vld [vmem:[%s338_s1] sm:$0xf]  ;;  %225 = vmatprep.mubr.msk.f32.mxu0 %vm267_vm2, %v266_v0  ;;  %v22_v4 = vld [vmem:[%s340_s3 + $0x8] sm:$0xff]  ;;  %v268_v6 = vmov 0.0|0.0   ;;  %v23_v7 = vld [vmem:[%s340_s3 + $0x10] sm:$0xff]  ;;  %vm127_vm3 = vcmask 523264  }
   0x2   :  { %v29_v2 = vld [vmem:[%s339_s0] sm:$0xff]  ;;  %224 = vmatpush3.msk.msra.mxu0 %vm41_vm0, %v20_v1  ;;  %244 = vmatprep.mubr.msk.f32.mxu1 %vm267_vm2, %v266_v0  ;;  %v24_v8 = vld [vmem:[%s340_s3 + $0x18] sm:$0xff]  ;;  %v26_v11 = vld [vmem:[%s340_s3 + $0x28] sm:$0xff]  ;;  %vm201_vm4 = vcmask 23552  }
   0x3   :  { %226 = vmatmul.mubr.msk.f32.vlgmr.msra.gmra.mrb[0].mxu0 %vm37_vm1, %v29_v2  ;;  %v21_v3 = vld [vmem:[%s340_s3] sm:$0xff]  ;;  %247 = vmatprep.subr.bf16.mxu1 %v268_v6  ;;  %v251_v9 = vpack.c.bf16 %v24_v8, %v23_v7  ;;  %v27_v13 = vld [vmem:[%s340_s3 + $0x30] sm:$0xff]  ;;  %v28_v14 = vld [vmem:[%s340_s3 + $0x38] sm:$0xff] }
   0x4   :  { %v248_v5 = vpack.c.bf16 %v22_v4, %v21_v3  ;;  %v25_v10 = vld [vmem:[%s340_s3 + $0x20] sm:$0xff]  ;;  %v257_v15 = vpack.c.bf16 %v28_v14, %v27_v13 }
   0x5   :  { %v254_v12 = vpack.c.bf16 %v26_v11, %v25_v10  ;;  %v207_v16 = vld [vmem:[%s341_s2] ss:$0 sm:$0xff] }
   0x6   :  { %249 = vmatpush3.bf16.msra.mxu1 %v248_v5  ;;  %v210_v25 = vld [vmem:[%s342_s4] ss:$0 sm:$0xff] }
   0x7   :  { %250 = vmatprep.subr.bf16.mxu1 %v268_v6 }
   0xa   :  { %252 = vmatpush3.bf16.msra.mxu1 %v251_v9 }
   0xb   :  { %253 = vmatprep.subr.bf16.mxu1 %v268_v6 }
   0xe   :  { %255 = vmatpush3.bf16.msra.mxu1 %v254_v12 }
   0xf   :  { %256 = vmatprep.subr.bf16.mxu1 %v268_v6 }
  0x12   :  { %258 = vmatpush3.bf16.msra.mxu1 %v257_v15 }
  0xd6   :  { %v111_v17 = vpop.f32.mrb[0].mxu0 }
  0xd7   :  { %v112_v18 = vadd.f32 %v207_v16, %v111_v17  ;;  %v227_v19 = vpop.f32.mrb[1].mxu0 }
  0xd9   :  { %v115_v20 = vsub.f32 0.0, %v112_v18 }
  0xdb   :  { %v116_v21 = vmul.f32 1.442695, %v115_v20 }
  0xdd   :  { %262 = vpow2.f32 %v116_v21 }
  0xe7   :  { %v263_v22 = vpop.eup %262 }
  0xe8   :  { %v118_v23 = vadd.f32 1.0, %v263_v22 }
  0xea   :  { %264 = vrcp.f32 %v118_v23 }
  0xf4   :  { %v265_v24 = vpop.eup %264 }
  0xf5   :  { %245 = vmatmul.mubr.msk.f32.vlgmr.msra.gmra.mrb[0].mxu1 %vm127_vm3, %v265_v24 }
 0x1c8   :  { %v197_v26 = vpop.f32.mrb[0].mxu1 }
 0x1c9   :  { %v198_v27 = vadd.f32 %v210_v25, %v197_v26  ;;  %v246_v28 = vpop.f32.mrb[1].mxu1 }
 0x1cb   :  { %202 = vst.msk [vmem:[%s343_s5] sm:$0xff] %vm201_vm4, %v198_v27 }

</bundles_post_ra>
